<compile_context>
chip_gen: v7x
topology: tpu7x:2x2x1
jax: 0.10.0
libtpu: 0.0.40
codegen_flags: <defaults>
</compile_context>

<pallas_src>
import functools

import jax
import jax.numpy as jnp
from jax.experimental import pallas as pl
from jax.experimental.pallas import tpu as pltpu

_LANE = 128
_P_COLS = 24  # packed parameter slab width (see _pack_params)


def _pack_params(params):
    """Pack (w1,b1,w2,b2,w3,b3) into one (16, 24) f32 slab (kept VMEM-resident)."""
    w1, b1, w2, b2, w3, b3 = params
    slab = jnp.zeros((16, _P_COLS), jnp.float32)
    slab = slab.at[:, 0:3].set(w1.astype(jnp.float32))                 # fc1 W (16, 3)
    slab = slab.at[:, 3].set(b1.astype(jnp.float32))                   # fc1 b (16,)
    slab = slab.at[0:8, 4:20].set(w2.astype(jnp.float32))              # fc2 W (8, 16)
    slab = slab.at[0:8, 20].set(b2.astype(jnp.float32))                # fc2 b (8,)
    slab = slab.at[0:8, 21].set(w3.reshape(8).astype(jnp.float32))     # fc3 W (8,)
    slab = slab.at[0, 22].set(b3.reshape(()).astype(jnp.float32))      # fc3 b ()
    return slab


def stability_net_kernel(x_ref, p_ref, o_ref, *, compute_dtype):
    # x_ref: (3, TB) — features on sublanes, batch lane-dense.  p_ref: (16, 24) param slab.
    cd = compute_dtype
    x = x_ref[...].astype(cd)                      # cast the tile once

    w1c0 = p_ref[:, 0:1].astype(cd)                # (16, 1)
    w1c1 = p_ref[:, 1:2].astype(cd)
    w1c2 = p_ref[:, 2:3].astype(cd)
    b1 = p_ref[:, 3:4].astype(cd)                  # (16, 1)
    w2 = p_ref[0:8, 4:20].astype(cd)               # (8, 16)
    b2 = p_ref[0:8, 20:21]                         # (8, 1)  f32
    w3 = p_ref[0:8, 21:22]                         # (8, 1)  f32
    b3 = p_ref[0:1, 22:23]                         # (1, 1)  f32

    # fc1: K=3 is far too small for the MXU -> 3 VPU broadcast-FMAs.
    # TODO(synk): if this Pallas build supports stride-0 sublane-broadcast loads
    # (x_ref[pl.ds(k, 16, stride=0), :]), use them to move the row broadcasts into the
    # vld slot and trim a few % of VALU filler.
    h1 = b1 + w1c0 * x[0:1, :] + w1c1 * x[1:2, :] + w1c2 * x[2:3, :]   # (16, TB)
    h1 = jnp.maximum(h1, 0.0)

    # fc2: (8,16) @ (16,TB) — small MXU dot, f32 accumulation.
    h2 = jnp.dot(w2, h1, preferred_element_type=jnp.float32) + b2      # (8, TB) f32
    h2 = jnp.maximum(h2, 0.0)

    # fc3: VPU multiply + XLU cross-sublane reduce (N=1 is not worth an MXU pass).
    z = jnp.sum(w3 * h2, axis=0, keepdims=True) + b3                   # (1, TB) f32

    # sigmoid: exp and approximate reciprocal both issue on the otherwise-idle EUP slot.
    o_ref[...] = pl.reciprocal(1.0 + jnp.exp(-z), approx=True)


def _default_compute_dtype():
    """bf16 intermediates on bf16-native VPUs (v6e / v7x), f32 otherwise (v5e & older)."""
    try:
        dev = jax.devices()[0]
        if dev.platform != "tpu":
            return jnp.float32
        kind = dev.device_kind.lower()
    except Exception:
        return jnp.float32
    if any(v in kind for v in ("v2", "v3", "v4", "v5")):
        return jnp.float32      # no native bf16 VPU/EUP path on these generations
    return jnp.bfloat16         # v6e / v7x: packed bf16 halves VALU issue count


def stability_net_forward(x, params, *, tb=64 * 1024, compute_dtype=None,
                          feature_major=False):
    """StabilityNet forward.

    x: (B, 3) float32 (PyTorch layout), or (3, B) with feature_major=True — the latter
       skips the wrapper-side transpose pass entirely (recommended for large-B producers;
       zero extra XLA passes when B is already a multiple of 128).
    params: (w1, b1, w2, b2, w3, b3) in PyTorch nn.Linear layout.
    Returns (B, 1) float32.
    """
    if compute_dtype is None:
        compute_dtype = _default_compute_dtype()

    # Feature-major, lane-dense layout: (3, B) with the batch on the 128-wide lane axis.
    x_t = x.astype(jnp.float32) if feature_major else x.astype(jnp.float32).T
    assert x_t.shape[0] == 3, "expected 3 input features"
    B = x_t.shape[1]

    # Batch tile: large (amortizes the ~0.35 us per-grid-step fixed cost), lane-multiple,
    # capped so the VMEM budget (double-buffered tiles + intermediates) also fits v7x.
    tb = max(_LANE, (min(int(tb), 128 * 1024) // _LANE) * _LANE)
    b_lane = pl.cdiv(B, _LANE) * _LANE
    tb = min(tb, b_lane)
    # Prefer >=2 grid steps whenever the batch allows it so the "parallel" batch axis can
    # be sharded across both TensorCores on v7x (single-TC chips just see one extra cheap
    # grid step).
    if b_lane >= 2 * _LANE and tb >= b_lane:
        tb = pl.cdiv(b_lane // 2, _LANE) * _LANE
    grid_b = pl.cdiv(b_lane, tb)

    # Pad the batch only up to the next lane multiple (<=127 columns), never to a multiple
    # of tb: ragged final grid blocks are masked by Pallas.  No pad at all if B % 128 == 0.
    if b_lane != B:
        x_t = jnp.pad(x_t, ((0, 0), (0, b_lane - B)))

    p_slab = _pack_params(params)

    # VMEM budget: x tile + out tile (each sublane-padded to 8 rows, double-buffered) plus
    # materialized intermediates (h1/h2/temps).  Generous upper bound, capped under v7x's
    # 64 MiB physical VMEM; also raises v5e's 16 MiB scoped default.
    vmem_bytes = int(min(max(640 * tb, 32 << 20) + (2 << 20), 48 << 20))

    kernel = functools.partial(stability_net_kernel, compute_dtype=compute_dtype)
    out_t = pl.pallas_call(
        kernel,
        out_shape=jax.ShapeDtypeStruct((1, b_lane), jnp.float32),
        grid_spec=pltpu.PrefetchScalarGridSpec(
            num_scalar_prefetch=0,
            grid=(grid_b,),
            in_specs=[
                pl.BlockSpec((3, tb), lambda i: (0, i)),        # x: pipelined batch tiles
                pl.BlockSpec((16, _P_COLS), lambda i: (0, 0)),  # params: VMEM-resident
            ],
            out_specs=pl.BlockSpec((1, tb), lambda i: (0, i)),  # lane-dense output slab
        ),
        compiler_params=pltpu.CompilerParams(
            dimension_semantics=("parallel",),   # v7x megacore: batch tiles split across TCs
            vmem_limit_bytes=vmem_bytes,
        ),
    )(x_t, p_slab)

    return out_t[:, :B].T                        # back to PyTorch's (B, 1)


def init_params(key):
    """PyTorch nn.Linear default init: U(-1/sqrt(fan_in), 1/sqrt(fan_in)), W stored (out, in)."""
    ks = jax.random.split(key, 6)

    def linear(kw, kb, fan_in, fan_out):
        bound = 1.0 / float(fan_in) ** 0.5
        w = jax.random.uniform(kw, (fan_out, fan_in), jnp.float32, -bound, bound)
        b = jax.random.uniform(kb, (fan_out,), jnp.float32, -bound, bound)
        return w, b

    w1, b1 = linear(ks[0], ks[1], 3, 16)
    w2, b2 = linear(ks[2], ks[3], 16, 8)
    w3, b3 = linear(ks[4], ks[5], 8, 1)
    return (w1, b1, w2, b2, w3, b3)


def reference_forward(x, params):
    w1, b1, w2, b2, w3, b3 = params
    h1 = jnp.maximum(x @ w1.T + b1, 0.0)
    h2 = jnp.maximum(h1 @ w2.T + b2, 0.0)
    return jax.nn.sigmoid(h2 @ w3.T + b3)


if __name__ == "__main__":
    key = jax.random.PRNGKey(0)
    k_x, k_p, k_x2 = jax.random.split(key, 3)
    params = init_params(k_p)

    # Small batch, forced f32 compute -> tight tolerance against the reference
    # (only deviation is the approximate EUP reciprocal inside the sigmoid).
    B = 8
    x = jax.random.normal(k_x, (B, 3), dtype=jnp.float32)
    out = jax.block_until_ready(
        stability_net_forward(x, params, compute_dtype=jnp.float32))
    ref = reference_forward(x, params)
    assert out.shape == (B, 1)
    assert jnp.allclose(out, ref, atol=2e-3, rtol=2e-3)

    # Ragged batch over multiple grid steps (exercises tiling, >=2-step split and the
    # masked ragged tail) with the auto compute dtype (bf16 on v6e/v7x, f32 on v5e).
    B2 = 300
    x2 = jax.random.normal(k_x2, (B2, 3), dtype=jnp.float32)
    cd = _default_compute_dtype()
    out2 = jax.block_until_ready(stability_net_forward(x2, params))
    ref2 = reference_forward(x2, params)
    tol = 2e-3 if cd == jnp.float32 else 3e-2
    assert out2.shape == (B2, 1)
    assert jnp.allclose(out2, ref2, atol=tol, rtol=tol)

    print("KERNEL_OK")
</pallas_src>

<mosaic_0001>
module attributes {stable_mosaic.version = 11 : i64} {
  func.func @stability_net_kernel(%arg0: i32, %arg1: memref<3x128xf32, #tpu.memory_space<vmem>>, %arg2: memref<16x24xf32, #tpu.memory_space<vmem>>, %arg3: memref<1x128xf32, #tpu.memory_space<vmem>>) attributes {dimension_semantics = [#tpu.dimension_semantics<parallel>], iteration_bounds = array<i64: 1>, scalar_prefetch = 0 : i64, scratch_operands = 0 : i64, tpu.core_type = #tpu.core_type<tc>, window_params = [{transform_indices = @transform_0, window_bounds = array<i64: 3, 128>}, {pipeline_mode = #tpu.pipeline_mode<synchronous>, transform_indices = @transform_1, window_bounds = array<i64: 16, 24>}, {transform_indices = @transform_2, window_bounds = array<i64: 1, 128>}]} {
    %c0 = arith.constant 0 : index
    %c0_0 = arith.constant 0 : index
    %0 = vector.load %arg1[%c0, %c0_0] : memref<3x128xf32, #tpu.memory_space<vmem>>, vector<3x128xf32>
    %c0_1 = arith.constant 0 : index
    %c0_2 = arith.constant 0 : index
    %1 = vector.load %arg2[%c0_1, %c0_2] : memref<16x24xf32, #tpu.memory_space<vmem>>, vector<16x1xf32>
    %c0_3 = arith.constant 0 : index
    %c1 = arith.constant 1 : index
    %2 = vector.load %arg2[%c0_3, %c1] : memref<16x24xf32, #tpu.memory_space<vmem>>, vector<16x1xf32>
    %c0_4 = arith.constant 0 : index
    %c2 = arith.constant 2 : index
    %3 = vector.load %arg2[%c0_4, %c2] : memref<16x24xf32, #tpu.memory_space<vmem>>, vector<16x1xf32>
    %c0_5 = arith.constant 0 : index
    %c3 = arith.constant 3 : index
    %4 = vector.load %arg2[%c0_5, %c3] : memref<16x24xf32, #tpu.memory_space<vmem>>, vector<16x1xf32>
    %c0_6 = arith.constant 0 : index
    %c4 = arith.constant 4 : index
    %5 = vector.load %arg2[%c0_6, %c4] : memref<16x24xf32, #tpu.memory_space<vmem>>, vector<8x16xf32>
    %c0_7 = arith.constant 0 : index
    %c20 = arith.constant 20 : index
    %6 = vector.load %arg2[%c0_7, %c20] : memref<16x24xf32, #tpu.memory_space<vmem>>, vector<8x1xf32>
    %c0_8 = arith.constant 0 : index
    %c21 = arith.constant 21 : index
    %7 = vector.load %arg2[%c0_8, %c21] : memref<16x24xf32, #tpu.memory_space<vmem>>, vector<8x1xf32>
    %c0_9 = arith.constant 0 : index
    %c22 = arith.constant 22 : index
    %8 = vector.load %arg2[%c0_9, %c22] : memref<16x24xf32, #tpu.memory_space<vmem>>, vector<1x1xf32>
    %9 = vector.extract_strided_slice %0 {offsets = [0, 0], sizes = [1, 128], strides = [1, 1]} : vector<3x128xf32> to vector<1x128xf32>
    %10 = vector.broadcast %1 : vector<16x1xf32> to vector<16x128xf32>
    %11 = vector.broadcast %9 : vector<1x128xf32> to vector<16x128xf32>
    %12 = arith.mulf %10, %11 : vector<16x128xf32>
    %13 = vector.broadcast %4 : vector<16x1xf32> to vector<16x128xf32>
    %14 = arith.addf %13, %12 : vector<16x128xf32>
    %15 = vector.extract_strided_slice %0 {offsets = [1, 0], sizes = [1, 128], strides = [1, 1]} : vector<3x128xf32> to vector<1x128xf32>
    %16 = vector.broadcast %2 : vector<16x1xf32> to vector<16x128xf32>
    %17 = vector.broadcast %15 : vector<1x128xf32> to vector<16x128xf32>
    %18 = arith.mulf %16, %17 : vector<16x128xf32>
    %19 = arith.addf %14, %18 : vector<16x128xf32>
    %20 = vector.extract_strided_slice %0 {offsets = [2, 0], sizes = [1, 128], strides = [1, 1]} : vector<3x128xf32> to vector<1x128xf32>
    %21 = vector.broadcast %3 : vector<16x1xf32> to vector<16x128xf32>
    %22 = vector.broadcast %20 : vector<1x128xf32> to vector<16x128xf32>
    %23 = arith.mulf %21, %22 : vector<16x128xf32>
    %24 = arith.addf %19, %23 : vector<16x128xf32>
    %cst = arith.constant 0.000000e+00 : f32
    %25 = vector.broadcast %cst : f32 to vector<16x128xf32>
    %26 = arith.maximumf %24, %25 : vector<16x128xf32>
    %cst_10 = arith.constant dense<0.000000e+00> : vector<8x128xf32>
    %27 = tpu.matmul %5, %26, %cst_10 {dimension_numbers = #tpu.dot_dimension_numbers<[1], [0], [0], [1], [0, 0, 1, 1], [], []>} : vector<8x16xf32>, vector<16x128xf32>, vector<8x128xf32> -> vector<8x128xf32>
    %28 = vector.broadcast %6 : vector<8x1xf32> to vector<8x128xf32>
    %29 = arith.addf %27, %28 : vector<8x128xf32>
    %cst_11 = arith.constant 0.000000e+00 : f32
    %30 = vector.broadcast %cst_11 : f32 to vector<8x128xf32>
    %31 = arith.maximumf %29, %30 : vector<8x128xf32>
    %32 = vector.broadcast %7 : vector<8x1xf32> to vector<8x128xf32>
    %33 = arith.mulf %32, %31 : vector<8x128xf32>
    %cst_12 = arith.constant dense<0.000000e+00> : vector<128xf32>
    %34 = vector.multi_reduction <add>, %33, %cst_12 [0] : vector<8x128xf32> to vector<128xf32>
    %35 = vector.shape_cast %34 : vector<128xf32> to vector<1x128xf32>
    %36 = vector.broadcast %8 : vector<1x1xf32> to vector<1x128xf32>
    %37 = arith.addf %35, %36 : vector<1x128xf32>
    %cst_13 = arith.constant 0.000000e+00 : f32
    %38 = vector.broadcast %cst_13 : f32 to vector<1x128xf32>
    %39 = arith.subf %38, %37 : vector<1x128xf32>
    %40 = math.exp %39 : vector<1x128xf32>
    %cst_14 = arith.constant 1.000000e+00 : f32
    %41 = vector.broadcast %cst_14 : f32 to vector<1x128xf32>
    %42 = arith.addf %41, %40 : vector<1x128xf32>
    %43 = tpu.reciprocal %42 {approx = true} : vector<1x128xf32> -> vector<1x128xf32>
    %c0_15 = arith.constant 0 : index
    %c0_16 = arith.constant 0 : index
    %44 = vector.load %arg3[%c0_15, %c0_16] : memref<1x128xf32, #tpu.memory_space<vmem>>, vector<1x128xf32>
    tpu.vector_store %arg3[%c0_15, %c0_16], %43 {strides = array<i32>} : memref<1x128xf32, #tpu.memory_space<vmem>>, vector<1x128xf32>,
    return
  }
  func.func @transform_0(%arg0: i32) -> (i32, i32) {
    %c0_i32 = arith.constant 0 : i32
    %c0_i32_0 = arith.constant 0 : i32
    return %c0_i32, %arg0 : i32, i32
  }
  func.func @transform_1(%arg0: i32) -> (i32, i32) {
    %c0_i32 = arith.constant 0 : i32
    %c0_i32_0 = arith.constant 0 : i32
    %c0_i32_1 = arith.constant 0 : i32
    return %c0_i32, %c0_i32_0 : i32, i32
  }
  func.func @transform_2(%arg0: i32) -> (i32, i32) {
    %c0_i32 = arith.constant 0 : i32
    %c0_i32_0 = arith.constant 0 : i32
    return %c0_i32, %arg0 : i32, i32
  }
}

</mosaic_0001>

<bundles_post_ra>
// kernel: tpu_custom_call.1
= control target key start
LH: loop header
LB: loop body
LE: loop exit
PB: predicated region body
PF: predicated region fallthrough
CT: control target
= control target key end

     0   :  { %7 = vsyncpa [#allocation3], 0  ;;  %s411_s0 = inlined_call_operand.hbm [shape: f32[3,128], index: 0, kind: input, shape index: {}]   ;;  %s412_s1 = inlined_call_operand.hbm [shape: f32[16,24], index: 1, kind: input, shape index: {}]   ;;  %s413_s2 = inlined_call_operand.hbm [shape: f32[1,128], index: 2, kind: output, shape index: {}]  }
   0x1   :  { %8 = vsyncpa [#allocation6], 0 }
   0x2   :  { %9 = vsyncpa [#allocation4], 0  ;;  %s337_s9 = smov [#allocation2]   ;;  %s338_s11 = smov [#allocation5]  }
   0x3   :  { %s16_s10 = sshll.u32 %s337_s9, 4  ;;  %s25_s12 = sshll.u32 %s338_s11, 4  ;;  %s17_s10 = int_to_ptr.vmem [resolvable:$true] %s16_s10  ;;  %s368_s12 = int_to_ptr.vmem [resolvable:$true] %s25_s12 }
   0x4   :  { %s265_s15 = scalar_lea.hbm %s411_s0, 64 }
   0x5   :  { %p266_p0 = scmp.ne.s32.totalorder %s411_s0, %s265_s15  ;;  %p269_p1 = scmp.lt.u32.totalorder %s265_s15, %s411_s0 }
   0x7   :  { %p271_p2 = pnand %p269_p1, %p266_p0 }
   0x9   :  { %274 = shalt.err (!%p271_p2)
}
   0xa   :  { %s275_s20 = scalar_lea.vmem %s17_s10, 64  ;;  %p280_p4 = scmp.lt.s32.totalorder %s17_s10, %s17_s10 }
   0xb   :  { %p276_p3 = scmp.ne.s32.totalorder %s17_s10, %s275_s20  ;;  %p281_p5 = scmp.lt.s32.totalorder %s275_s20, %s275_s20 }
   0xd   :  { %p282_p6 = por %p281_p5, %p280_p4 }
   0xf   :  { %p283_p7 = pnand %p282_p6, %p276_p3 }
  0x11   :  { %286 = shalt.err (!%p283_p7)
}
  0x12   :  { %19 = dma.hbm_to_vmem [thread:$0]  %s411_s0, 64, %s17_s10, [#allocation3]  }
  0x13   :  { %s287_s25 = scalar_lea.hbm %s412_s1, 256 }
  0x14   :  { %p288_p8 = scmp.ne.s32.totalorder %s412_s1, %s287_s25  ;;  %p291_p9 = scmp.lt.u32.totalorder %s287_s25, %s412_s1 }
  0x16   :  { %p293_p10 = pnand %p291_p9, %p288_p8 }
  0x18   :  { %296 = shalt.err (!%p293_p10)
}
  0x19   :  { %s297_s30 = scalar_lea.vmem %s368_s12, 256  ;;  %p302_p12 = scmp.lt.s32.totalorder %s368_s12, %s368_s12 }
  0x1a   :  { %p298_p11 = scmp.ne.s32.totalorder %s368_s12, %s297_s30  ;;  %p303_p13 = scmp.lt.s32.totalorder %s297_s30, %s297_s30 }
  0x1c   :  { %p304_p0 = por %p303_p13, %p302_p12 }
  0x1e   :  { %p305_p1 = pnand %p304_p0, %p298_p11 }
  0x20   :  { %308 = shalt.err (!%p305_p1)
}
  0x21   :  { %s339_s0 = smov 128   ;;  %s340_s3 = smov 8  }
  0x22   :  { %31 = dma.hbm_to_vmem [thread:$0]  %s412_s1, 256, %s368_s12, [#allocation6], %s339_s0, %s339_s0, %s340_s3  }
  0x23   :  { %331 = dma.done.wait [#allocation3], 64  }
  0x24   :  { %332 = vsyncadd [#allocation3], 4294967232 }
  0x25   :  { %333 = dma.done.wait [#allocation6], 256  }
  0x26   :  { %334 = vsyncadd [#allocation6], 4294967040  ;;  %v341_v0 = vmov 3   ;;  %v342_v1 = vmov 0   ;;  %v39_v2 = vld [vmem:[#allocation5] sm:$0xff]  ;;  %v40_v3 = vld [vmem:[#allocation5 + $0x8] sm:$0xff]  ;;  %v52_v12 = vlaneseq }
  0x27   :  { %252 = vset.pattern.permute.xlu1 %v341_v0  ;;  %251 = vset.pattern.permute.xlu0 %v342_v1  ;;  %v343_v4 = vmov 1   ;;  %v344_v5 = vmov 2   ;;  %s345_s1 = smov 124   ;;  %v346_v6 = vmov 0.0|0.0   ;;  %vm347_vm0 = vmmov 0   ;;  %s352_s6 = smov [#allocation7]  }
  0x28   :  { %59 = vperm.xlu1 %252, %v39_v2   ;;  %44 = vperm.xlu0 %251, %v39_v2   ;;  %v348_v7 = vmov 0.0   ;;  %v349_v8 = vmov 20   ;;  %v350_v9 = vmov 21   ;;  %v41_v10 = vld [vmem:[#allocation5] sm:$0x1]  ;;  %v351_v11 = vmov 22  }
  0x29   :  { %232 = vmatprep.subr.bf16.mxu0 %v346_v6  ;;  %229 = vmatprep.mubr.msk.f32.mxu0 %vm347_vm0, %v348_v7  ;;  %v53_v13 = vshrl.u32 %v52_v12, 7  ;;  %v38_v17 = vld [vmem:[#allocation2] sm:$0x7]  ;;  %vm108_vm1 = vcmask 130048   ;;  %s211_s7 = sshll.u32 %s352_s6, 4  ;;  %s212_s7 = int_to_ptr.vmem [resolvable:$true] %s211_s7 }
  0x2a   :  { %s309_s8 = scalar_lea.vmem %s212_s7, 16  ;;  %s313_s9 = scalar_lea.vmem %s212_s7, 32 }
  0x2b   :  { %v54_v16 = vsub.s32 0, %v53_v13  ;;  %v78_v18 = vsub.s32 1, %v53_v13  ;;  %v94_v23 = vsub.s32 2, %v53_v13  ;;  %p310_p2 = scmp.ne.s32.totalorder %s212_s7, %s309_s8  ;;  %p314_p3 = scmp.lt.s32.totalorder %s212_s7, %s212_s7 }
  0x2c   :  { %63 = vperm.xlu1 %252, %v40_v3   ;;  %49 = vperm.xlu0 %251, %v40_v3   ;;  %p315_p4 = scmp.lt.s32.totalorder %s313_s9, %s309_s8 }
  0x2d   :  { %v55_v21 = vrot.slane %v38_v17, %v54_v16  ;;  %v79_v22 = vrot.slane %v38_v17, %v78_v18  ;;  %v95_v30 = vrot.slane %v38_v17, %v94_v23 }
  0x2e   :  { %p316_p5 = por %p315_p4, %p314_p3 }
  0x30   :  { %254 = vset.pattern.permute.xlu1 %v343_v4  ;;  %253 = vset.pattern.permute.xlu0 %v343_v4  ;;  %p317_p6 = pnand %p316_p5, %p310_p2 }
  0x31   :  { %73 = vperm.xlu1 %254, %v40_v3   ;;  %69 = vperm.xlu0 %253, %v39_v2  }
  0x35   :  { %255 = vset.pattern.permute.xlu1 %v344_v5  ;;  %256 = vset.pattern.permute.xlu0 %v344_v5 }
  0x36   :  { %85 = vperm.xlu1 %255, %v39_v2   ;;  %89 = vperm.xlu0 %256, %v40_v3  }
  0x3a   :  { %106 = vrot.lane.b32.xlu1 %v39_v2, %s345_s1  ;;  %258 = vset.pattern.permute.xlu0 %v350_v9 }
  0x3b   :  { %257 = vset.pattern.permute.xlu1 %v349_v8  ;;  %183 = vperm.xlu0 %258, %v39_v2  }
  0x3e   :  { %103 = vperm.xlu1 %257, %v39_v2  }
  0x3f   :  { %260 = vset.pattern.permute.xlu0 %v351_v11 }
  0x42   :  { %259 = vset.pattern.permute.xlu1 %v351_v11 }
  0x43   :  { %195 = vperm.xlu1 %259, %v41_v10  }
  0xa7   :  { %v60_v14 = vpop.permute.xlu1 %59  ;;  %v45_v15 = vpop.permute.xlu0 %44 }
  0xa8   :  { %v56_v24 = vmul.f32 %v55_v21, %v45_v15 }
  0xaa   :  { %v66_v31 = vadd.f32 %v60_v14, %v56_v24 }
  0xab   :  { %v64_v19 = vpop.permute.xlu1 %63  ;;  %v50_v20 = vpop.permute.xlu0 %49 }
  0xac   :  { %v57_v25 = vmul.f32 %v55_v21, %v50_v20 }
  0xae   :  { %v67_v32 = vadd.f32 %v64_v19, %v57_v25 }
  0xb0   :  { %v74_v26 = vpop.permute.xlu1 %73  ;;  %v70_v27 = vpop.permute.xlu0 %69 }
  0xb1   :  { %v81_v28 = vmul.f32 %v79_v22, %v74_v26  ;;  %v80_v29 = vmul.f32 %v79_v22, %v70_v27 }
  0xb3   :  { %v83_v35 = vadd.f32 %v81_v28, %v67_v32  ;;  %v82_v36 = vadd.f32 %v80_v29, %v66_v31 }
  0xb5   :  { %v86_v33 = vpop.permute.xlu1 %85  ;;  %v90_v34 = vpop.permute.xlu0 %89 }
  0xb6   :  { %v96_v37 = vmul.f32 %v95_v30, %v86_v33  ;;  %v97_v38 = vmul.f32 %v95_v30, %v90_v34 }
  0xb8   :  { %v98_v39 = vadd.f32 %v96_v37, %v82_v36  ;;  %v99_v40 = vadd.f32 %v97_v38, %v83_v35 }
  0xb9   :  { %v107_v44 = vpop.permute.xlu1 %106 }
  0xba   :  { %v100_v41 = vmax.f32 %v98_v39, 0.0  ;;  %v101_v42 = vmax.f32 %v99_v40, 0.0  ;;  %v184_v49 = vpop.permute.xlu0 %183 }
  0xbc   :  { %v233_v43 = vpack.c.bf16 %v101_v42, %v100_v41 }
  0xbd   :  { %v104_v45 = vpop.permute.xlu1 %103 }
  0xbe   :  { %234 = vmatpush3.bf16.msra.mxu0 %v233_v43 }
  0xc1   :  { %230 = vmatmul.mubr.msk.f32.vlgmr.msra.gmra.mrb[0].mxu0 %vm108_vm1, %v107_v44 }
  0xc2   :  { %v196_v57 = vpop.permute.xlu1 %195 }
 0x194   :  { %v177_v46 = vpop.f32.mrb[0].mxu0 }
 0x195   :  { %v178_v47 = vadd.f32 %v177_v46, %v104_v45  ;;  %v231_v48 = vpop.f32.mrb[1].mxu0 }
 0x197   :  { %v181_v50 = vmax.f32 %v178_v47, 0.0 }
 0x199   :  { %v186_v51 = vmul.f32 %v184_v49, %v181_v50 }
 0x19b   :  { %v187_v52 = vrot.slane %v186_v51, 4 }
 0x19d   :  { %v188_v53 = vadd.f32 %v187_v52, %v186_v51 }
 0x19f   :  { %v189_v54 = vrot.slane %v188_v53, 2 }
 0x1a1   :  { %v190_v55 = vadd.f32 %v189_v54, %v188_v53 }
 0x1a3   :  { %v191_v56 = vrot.slane %v190_v55, 1 }
 0x1a5   :  { %v192_v58 = vadd.f32 %v191_v56, %v190_v55 }
 0x1a7   :  { %v198_v59 = vadd.f32 %v196_v57, %v192_v58 }
 0x1a9   :  { %v199_v60 = vsub.f32 0.0, %v198_v59 }
 0x1ab   :  { %v200_v61 = vmul.f32 1.442695, %v199_v60 }
 0x1ad   :  { %261 = vpow2.f32 %v200_v61 }
 0x1b7   :  { %v262_v62 = vpop.eup %261 }
 0x1b8   :  { %v202_v63 = vadd.f32 1.0, %v262_v62 }
 0x1ba   :  { %263 = vrcp.f32 %v202_v63 }
 0x1c4   :  { %v264_v0 = vpop.eup %263 }
 0x1c5   :  { %204 = vst [vmem:[#allocation7] sm:$0x1] %v264_v0 }
 0x1c6   :  { %320 = shalt.err (!%p317_p6)
}
 0x1c7   :  { %s321_s12 = scalar_lea.hbm %s413_s2, 16 }
 0x1c8   :  { %p322_p7 = scmp.ne.s32.totalorder %s413_s2, %s321_s12  ;;  %p325_p8 = scmp.lt.u32.totalorder %s321_s12, %s413_s2 }
 0x1ca   :  { %p327_p9 = pnand %p325_p8, %p322_p7 }
 0x1cc   :  { %330 = shalt.err (!%p327_p9)
}
 0x1cd   :  { %214 = dma.vmem_to_hbm [thread:$0]  %s212_s7, 16, %s413_s2, [#allocation4]  }
 0x1ce   :  { %335 = dma.done.wait [#allocation4], 16  }
 0x1cf   :  { %336 = vsyncadd [#allocation4], 4294967280 }
 0x1d0   :  { %218 = vsyncpa [#allocation3], 1 }
 0x1d1   :  { %219 = vsyncpa [#allocation6], 1 }
 0x1d2   :  { %220 = vsyncpa [#allocation4], 1 }

</bundles_post_ra>
